<compile_context>
chip_gen: v5e
topology: v5e:2x2
jax: 0.10.0
libtpu: 0.0.40
codegen_flags: <defaults>
</compile_context>

<pallas_src>
import math
from functools import partial

import numpy as np
import jax
import jax.numpy as jnp
from jax.experimental import pallas as pl
from jax.experimental.pallas import tpu as pltpu


# ----------------------------------------------------------------------------
# Host-side frequency table (compile-time constant; no exp on the EUP).
# ----------------------------------------------------------------------------
def _freq_table(dim: int) -> jnp.ndarray:
    assert dim % 2 == 0 and dim >= 4, "dim must be even and >= 4"
    half = dim // 2
    scale = math.log(10000.0) / (half - 1)
    freqs = np.exp(np.arange(half, dtype=np.float64) * -scale).astype(np.float32)
    return jnp.asarray(freqs).reshape(1, half)          # (1, half)


def _pad_batch(time: jax.Array):
    """Pad the batch to a multiple of 8 (f32 sublane). Fuses under jit."""
    B = time.shape[0]
    B_pad = ((B + 7) // 8) * 8
    t = jnp.zeros((B_pad, 1), jnp.float32).at[:B, 0].set(time.astype(jnp.float32))
    return t, B, B_pad


def _full_vmem_spec(shape):
    return pl.BlockSpec(shape, lambda: (0,) * len(shape),
                        memory_space=pltpu.MemorySpace.VMEM)


# ----------------------------------------------------------------------------
# Kernel 1: sinusoidal position embeddings only.
# ----------------------------------------------------------------------------
def _sinusoidal_kernel(time_ref, freqs_ref, out_ref):
    # time_ref: (B, 1) f32, freqs_ref: (1, half) f32, out_ref: (B, 2*half) f32
    half = freqs_ref.shape[1]
    args = time_ref[...] * freqs_ref[...]                # (B, half) broadcast
    # Two lane-aligned slice stores (half = 128 lanes) — no concatenate op.
    out_ref[:, :half] = jnp.sin(args)
    out_ref[:, half:] = jnp.cos(args)


@partial(jax.jit, static_argnums=(1,))
def sinusoidal_position_embeddings(time: jax.Array, dim: int) -> jax.Array:
    """time: (B,) timesteps -> (B, dim) f32 embeddings (sin | cos)."""
    freqs = _freq_table(dim)
    half = dim // 2
    time_2d, B, B_pad = _pad_batch(time)

    out = pl.pallas_call(
        _sinusoidal_kernel,
        out_shape=jax.ShapeDtypeStruct((B_pad, dim), jnp.float32),
        in_specs=[
            _full_vmem_spec((B_pad, 1)),
            _full_vmem_spec((1, half)),
        ],
        out_specs=_full_vmem_spec((B_pad, dim)),
    )(time_2d, freqs)
    return out[:B]


# ----------------------------------------------------------------------------
# Kernel 2: fused time_mlp = SinusoidalPositionEmbeddings -> Linear -> ReLU
#                            -> Linear            (matches UNet.time_mlp)
# ----------------------------------------------------------------------------
def _time_mlp_kernel(time_ref, freqs_ref, w1_ref, b1_ref, w2_ref, b2_ref, out_ref):
    # time: (B,1) f32; freqs: (1,half) f32; w1,w2: (dim,dim) bf16;
    # b1,b2: (1,dim) f32; out: (B,dim) f32
    args = time_ref[...] * freqs_ref[...]                # (B, half) f32
    s = jnp.sin(args)
    c = jnp.cos(args)
    # Lane-dim concat at the 128-lane vreg boundary: pure placement, no XLU.
    # Gives one K=256 MXU pass instead of two K=128 passes + a VPU add.
    emb = jnp.concatenate([s, c], axis=-1).astype(jnp.bfloat16)   # (B, dim) bf16
    h = jnp.dot(emb, w1_ref[...], preferred_element_type=jnp.float32)
    h = jnp.maximum(h + b1_ref[...], 0.0)                # bias + ReLU in f32
    y = jnp.dot(h.astype(jnp.bfloat16), w2_ref[...],
                preferred_element_type=jnp.float32)
    out_ref[...] = y + b2_ref[...]


@jax.jit
def time_mlp_forward(time: jax.Array, w1: jax.Array, b1: jax.Array,
                     w2: jax.Array, b2: jax.Array) -> jax.Array:
    """UNet.time_mlp forward.

    w1, w2: (dim, dim) laid out (in, out) so the kernel computes x @ W
    (pass PyTorch nn.Linear.weight.T).  b1, b2: (dim,).
    """
    dim = w1.shape[0]
    assert w1.shape == (dim, dim) and w2.shape == (dim, dim)
    half = dim // 2
    freqs = _freq_table(dim)
    time_2d, B, B_pad = _pad_batch(time)
    b1_2d = b1.astype(jnp.float32).reshape(1, dim)
    b2_2d = b2.astype(jnp.float32).reshape(1, dim)
    # bf16 weights: native MXU input dtype, halves the dominant weight DMA.
    w1_bf = w1.astype(jnp.bfloat16)
    w2_bf = w2.astype(jnp.bfloat16)

    # No grid: total VMEM residency ~0.3 MiB, fully resident single invocation.
    # TODO(synk): for large training batches add grid=(cdiv(B_pad, 256),) over
    # the batch axis with dimension_semantics=("parallel",) for v7x dual-TC.
    out = pl.pallas_call(
        _time_mlp_kernel,
        out_shape=jax.ShapeDtypeStruct((B_pad, dim), jnp.float32),
        in_specs=[
            _full_vmem_spec((B_pad, 1)),     # time
            _full_vmem_spec((1, half)),      # freqs
            _full_vmem_spec((dim, dim)),     # w1 (bf16)
            _full_vmem_spec((1, dim)),       # b1
            _full_vmem_spec((dim, dim)),     # w2 (bf16)
            _full_vmem_spec((1, dim)),       # b2
        ],
        out_specs=_full_vmem_spec((B_pad, dim)),
    )(time_2d, freqs, w1_bf, b1_2d, w2_bf, b2_2d)
    return out[:B]


# ----------------------------------------------------------------------------
# References (numpy float64, using the same f32-rounded frequency table).
# ----------------------------------------------------------------------------
def _embed_reference(time, dim):
    freqs = np.asarray(_freq_table(dim), dtype=np.float64)       # (1, half)
    t = np.asarray(time, dtype=np.float64)[:, None]
    args = t * freqs
    return np.concatenate([np.sin(args), np.cos(args)], axis=1)


def _time_mlp_reference(time, w1, b1, w2, b2, dim):
    emb = _embed_reference(time, dim)
    h = np.maximum(emb @ np.asarray(w1, np.float64) + np.asarray(b1, np.float64), 0.0)
    return h @ np.asarray(w2, np.float64) + np.asarray(b2, np.float64)


if __name__ == "__main__":
    key = jax.random.PRNGKey(0)
    k1, k2, k3, k4, k5 = jax.random.split(key, 5)

    B, DIM = 8, 256                      # time_dim=256 from the UNet spec
    # Diffusion timesteps: integer-valued scalars in [1, 1000)
    time = jnp.floor(
        jax.random.uniform(k1, (B,), dtype=jnp.float32, minval=1.0, maxval=1000.0)
    )
    w1 = jax.random.normal(k2, (DIM, DIM), jnp.float32) * 0.05
    b1 = jax.random.normal(k3, (DIM,), jnp.float32) * 0.05
    w2 = jax.random.normal(k4, (DIM, DIM), jnp.float32) * 0.05
    b2 = jax.random.normal(k5, (DIM,), jnp.float32) * 0.05

    # Kernel 1: embeddings (pure f32)
    emb = jax.block_until_ready(sinusoidal_position_embeddings(time, DIM))
    emb_ref = _embed_reference(time, DIM)
    np.testing.assert_allclose(np.asarray(emb, np.float64), emb_ref,
                               rtol=0.0, atol=1e-3)
    assert emb.shape == (B, DIM) and emb.dtype == jnp.float32

    # Kernel 2: fused time-MLP (bf16 MXU inputs, f32 accumulation)
    t_out = jax.block_until_ready(time_mlp_forward(time, w1, b1, w2, b2))
    t_ref = _time_mlp_reference(time, w1, b1, w2, b2, DIM)
    np.testing.assert_allclose(np.asarray(t_out, np.float64), t_ref,
                               rtol=3e-2, atol=3e-2)
    assert t_out.shape == (B, DIM) and t_out.dtype == jnp.float32

    print("KERNEL_OK")
</pallas_src>

<mosaic_0001>
module attributes {stable_mosaic.version = 11 : i64} {
  func.func @_sinusoidal_kernel(%arg0: memref<8x1xf32, #tpu.memory_space<vmem>>, %arg1: memref<1x128xf32, #tpu.memory_space<vmem>>, %arg2: memref<8x256xf32, #tpu.memory_space<vmem>>) attributes {dimension_semantics = [], scalar_prefetch = 0 : i64, scratch_operands = 0 : i64, tpu.core_type = #tpu.core_type<tc>} {
    %c0 = arith.constant 0 : index
    %c0_0 = arith.constant 0 : index
    %0 = vector.load %arg0[%c0, %c0_0] : memref<8x1xf32, #tpu.memory_space<vmem>>, vector<8x1xf32>
    %c0_1 = arith.constant 0 : index
    %c0_2 = arith.constant 0 : index
    %1 = vector.load %arg1[%c0_1, %c0_2] : memref<1x128xf32, #tpu.memory_space<vmem>>, vector<1x128xf32>
    %2 = vector.broadcast %0 : vector<8x1xf32> to vector<8x128xf32>
    %3 = vector.broadcast %1 : vector<1x128xf32> to vector<8x128xf32>
    %4 = arith.mulf %2, %3 : vector<8x128xf32>
    %5 = math.sin %4 : vector<8x128xf32>
    %c0_3 = arith.constant 0 : index
    %c0_4 = arith.constant 0 : index
    %6 = vector.load %arg2[%c0_3, %c0_4] : memref<8x256xf32, #tpu.memory_space<vmem>>, vector<8x128xf32>
    tpu.vector_store %arg2[%c0_3, %c0_4], %5 {strides = array<i32>} : memref<8x256xf32, #tpu.memory_space<vmem>>, vector<8x128xf32>,
    %7 = math.cos %4 : vector<8x128xf32>
    %c0_5 = arith.constant 0 : index
    %c128 = arith.constant 128 : index
    %8 = vector.load %arg2[%c0_5, %c128] : memref<8x256xf32, #tpu.memory_space<vmem>>, vector<8x128xf32>
    tpu.vector_store %arg2[%c0_5, %c128], %7 {strides = array<i32>} : memref<8x256xf32, #tpu.memory_space<vmem>>, vector<8x128xf32>,
    return
  }
}

</mosaic_0001>

<bundles_post_ra>
// kernel: sinusoidal_position_embeddings.1
= control target key start
LH: loop header
LB: loop body
LE: loop exit
PB: predicated region body
PF: predicated region fallthrough
CT: control target
= control target key end

     0   :  { %v392_v1 = vmov 0   ;;  %s485_s0 = inlined_call_operand.vmem [shape: f32[8,1], index: 0, kind: input, shape index: {}]   ;;  %s486_s1 = inlined_call_operand.vmem [shape: f32[1,128], index: 1, kind: input, shape index: {}]   ;;  %s487_s2 = inlined_call_operand.hbm [shape: f32[8,256], index: 2, kind: output, shape index: {}]  }
   0x1   :  { %v12_v0 = vld [vmem:[%s485_s0] sm:$0xff]  ;;  %364 = vset.pattern.permute.xlu0 %v392_v1 }
   0x2   :  { %16 = vperm.xlu0 %364, %v12_v0  }
   0x3   :  { %7 = vsyncpa [#allocation3], 0  ;;  %v365_v2 = vld [vmem:[%s486_s1] ss:$0 sm:$0xff]  ;;  %v393_v16 = vmov 683565275  }
   0x4   :  { %v394_v18 = vmov 2475754826   ;;  %v395_v21 = vmov 2131351028   ;;  %v396_v24 = vmov 2102212464  }
   0x5   :  { %v397_v27 = vmov 920167782   ;;  %v398_v30 = vmov 1326507024   ;;  %s399_s0 = smov [#allocation2]   ;;  %s341_s15 = sshll.u32 %s487_s2, 4  ;;  %s342_s15 = int_to_ptr.hbm [resolvable:$true] %s341_s15 }
   0x6   :  { %s339_s1 = sshll.u32 %s399_s0, 4  ;;  %s340_s1 = int_to_ptr.vmem [resolvable:$true] %s339_s1 }
  0x74   :  { %v17_v3 = vpop.permute.xlu0 %16 }
  0x75   :  { %v422_v4 = vmul.f32 %v365_v2, %v17_v3 }
  0x77   :  { %v26_v5 = vand.u32 2139095040, %v422_v4  ;;  %v23_v8 = vand.u32 2147483647, %v422_v4  ;;  %vm25_vm12 = vcmp.lt.s32.totalorder %v422_v4, 0 }
  0x79   :  { %v27_v6 = vshrl.u32 %v26_v5, 23  ;;  %v30_v10 = vand.u32 8388607, %v23_v8  ;;  %vm24_vm13 = vcmp.le.f32.partialorder %v23_v8, 0.7853982 }
  0x7b   :  { %v350_v7 = vadd.s32 4294967169, %v27_v6  ;;  %v31_v14 = vor.u32 8388608, %v30_v10 }
  0x7d   :  { %v33_v9 = vadd.s32 1, %v350_v7  ;;  %v439_v37 = vshll.u32 %v31_v14, 8 }
  0x7f   :  { %vm34_vm0 = vcmp.gt.s32.totalorder %v33_v9, 0  ;;  %v72_v46 = vand.u32 65535, %v439_v37  ;;  %v73_v47 = vshrl.u32 %v439_v37, 16 }
  0x80   :  { %v35_v11 = vsel %vm34_vm0, %v33_v9, 0 }
  0x81   :  { %v37_v12 = vand.u32 31, %v35_v11  ;;  %v430_v15 = vshrl.u32 %v35_v11, 5 }
  0x83   :  { %v428_v13 = vsub.s32 32, %v37_v12  ;;  %v40_v17 = vshll.u32 %v393_v16, %v37_v12  ;;  %v43_v19 = vshll.u32 %v394_v18, %v37_v12  ;;  %v46_v23 = vshll.u32 %v395_v21, %v37_v12 }
  0x84   :  { %v49_v26 = vshll.u32 %v396_v24, %v37_v12  ;;  %v52_v29 = vshll.u32 %v397_v27, %v37_v12  ;;  %vm55_vm1 = vcmp.lt.s32.totalorder %v430_v15, 1  ;;  %vm58_vm2 = vcmp.lt.s32.totalorder %v430_v15, 4 }
  0x85   :  { %v41_v20 = vshrl.u32 %v394_v18, %v428_v13  ;;  %v44_v22 = vshrl.u32 %v395_v21, %v428_v13  ;;  %v47_v25 = vshrl.u32 %v396_v24, %v428_v13  ;;  %v50_v28 = vshrl.u32 %v397_v27, %v428_v13 }
  0x86   :  { %v53_v31 = vshrl.u32 %v398_v30, %v428_v13  ;;  %vm57_vm3 = vcmp.lt.s32.totalorder %v430_v15, 3  ;;  %vm56_vm4 = vcmp.lt.s32.totalorder %v430_v15, 2  ;;  %v39_v11 = vshrl.u32 %v393_v16, %v428_v13 }
  0x87   :  { %v42_v32 = vor.u32 %v41_v20, %v40_v17  ;;  %v45_v33 = vor.u32 %v44_v22, %v43_v19  ;;  %v48_v34 = vor.u32 %v47_v25, %v46_v23  ;;  %v51_v35 = vor.u32 %v50_v28, %v49_v26 }
  0x88   :  { %v54_v36 = vor.u32 %v53_v31, %v52_v29 }
  0x89   :  { %v63_v38 = vsel %vm55_vm1, %v42_v32, %v45_v33  ;;  %v67_v39 = vsel %vm55_vm1, %v45_v33, %v48_v34  ;;  %v64_v40 = vsel %vm58_vm2, %v51_v35, 920167782  ;;  %v60_v7 = vsel %vm58_vm2, %v48_v34, 2102212464 }
  0x8a   :  { %v68_v41 = vsel %vm58_vm2, %v54_v36, 1326507024  ;;  %v65_v42 = vsel %vm57_vm3, %v48_v34, %v64_v40  ;;  %v59_v20 = vsel %vm55_vm1, %v39_v11, %v42_v32  ;;  %v61_v21 = vsel %vm57_vm3, %v45_v33, %v60_v7 }
  0x8b   :  { %v69_v43 = vsel %vm57_vm3, %v51_v35, %v68_v41  ;;  %v66_v44 = vsel %vm56_vm4, %v63_v38, %v65_v42  ;;  %v62_v13 = vsel %vm56_vm4, %v59_v20, %v61_v21 }
  0x8c   :  { %v70_v45 = vsel %vm56_vm4, %v67_v39, %v69_v43  ;;  %v96_v50 = vand.u32 65535, %v66_v44  ;;  %v97_v51 = vshrl.u32 %v66_v44, 16  ;;  %v116_v28 = vmul.u32 %v439_v37, %v62_v13 }
  0x8d   :  { %v74_v48 = vand.u32 65535, %v70_v45  ;;  %v75_v49 = vshrl.u32 %v70_v45, 16  ;;  %vm166_vm4 = vweird.f32 %v422_v4 }
  0x8e   :  { %v99_v54 = vmul.u32 %v97_v51, %v72_v46  ;;  %v100_v55 = vmul.u32 %v96_v50, %v73_v47  ;;  %v98_v59 = vmul.u32 %v96_v50, %v72_v46  ;;  %v101_v63 = vmul.u32 %v97_v51, %v73_v47 }
  0x8f   :  { %v77_v52 = vmul.u32 %v75_v49, %v72_v46  ;;  %v78_v53 = vmul.u32 %v74_v48, %v73_v47  ;;  %v76_v56 = vmul.u32 %v74_v48, %v72_v46  ;;  %v79_v58 = vmul.u32 %v75_v49, %v73_v47 }
  0x90   :  { %v102_v60 = vshll.u32 %v99_v54, 16  ;;  %v104_v2 = vshll.u32 %v100_v55, 16  ;;  %v103_v18 = vshrl.u32 %v99_v54, 16  ;;  %v105_v24 = vshrl.u32 %v100_v55, 16 }
  0x91   :  { %v80_v57 = vshll.u32 %v77_v52, 16  ;;  %v82_v61 = vshll.u32 %v78_v53, 16  ;;  %v81_v12 = vshrl.u32 %v77_v52, 16  ;;  %v83_v22 = vshrl.u32 %v78_v53, 16 }
  0x92   :  { %vm106_vm6 = vc.u32 %v98_v59, %v102_v60  ;;  %v108_v3 = vadd.s32 %v102_v60, %v98_v59 }
  0x93   :  { %vm84_vm5 = vc.u32 %v76_v56, %v80_v57  ;;  %v86_v62 = vadd.s32 %v80_v57, %v76_v56  ;;  %v107_v6 = vsel %vm106_vm6, 1, %v392_v1 }
  0x94   :  { %v85_v0 = vsel %vm84_vm5, 1, %v392_v1  ;;  %v109_v10 = vadd.s32 %v107_v6, %v101_v63  ;;  %vm110_vm8 = vc.u32 %v108_v3, %v104_v2  ;;  %v112_v27 = vadd.s32 %v108_v3, %v104_v2 }
  0x95   :  { %v87_v5 = vadd.s32 %v85_v0, %v79_v58  ;;  %vm88_vm7 = vc.u32 %v86_v62, %v82_v61  ;;  %v111_v17 = vsel %vm110_vm8, 1, %v392_v1 }
  0x96   :  { %v89_v9 = vsel %vm88_vm7, 1, %v392_v1  ;;  %v113_v19 = vadd.s32 %v111_v17, %v109_v10 }
  0x97   :  { %v91_v14 = vadd.s32 %v89_v9, %v87_v5 }
  0x98   :  { %v114_v25 = vadd.s32 %v113_v19, %v103_v18 }
  0x99   :  { %v92_v23 = vadd.s32 %v91_v14, %v81_v12 }
  0x9a   :  { %v115_v16 = vadd.s32 %v114_v25, %v105_v24 }
  0x9b   :  { %v93_v26 = vadd.s32 %v92_v23, %v83_v22 }
  0x9c   :  { %v119_v1 = vadd.s32 1, %v115_v16 }
  0x9d   :  { %vm118_vm9 = vc.u32 %v93_v26, %v112_v27  ;;  %v117_v15 = vadd.s32 %v112_v27, %v93_v26 }
  0x9e   :  { %v120_v29 = vsel %vm118_vm9, %v119_v1, %v115_v16 }
  0x9f   :  { %v121_v30 = vadd.s32 %v120_v29, %v116_v28 }
  0xa1   :  { %v122_v31 = vadd.s32 536870912, %v121_v30 }
  0xa3   :  { %v123_v32 = vshrl.u32 %v122_v31, 30 }
  0xa5   :  { %v124_v34 = vshll.u32 %v123_v32, 30  ;;  %v147_v53 = vsub.s32 4, %v123_v32 }
  0xa7   :  { %v125_v33 = vsub.s32 %v121_v30, %v124_v34  ;;  %v148_v58 = vsel %vm25_vm12, %v147_v53, %v123_v32 }
  0xa8   :  { %v150_v61 = vsel %vm24_vm13, 0, %v148_v58 }
  0xa9   :  { %vm126_vm10 = vcmp.lt.s32.totalorder %v125_v33, 0  ;;  %v127_v35 = vsub.s32 0, %v125_v33  ;;  %v167_v3 = vadd.s32 3, %v150_v61  ;;  %v323_v9 = vand.u32 3, %v150_v61 }
  0xab   :  { %v128_v36 = vsel %vm126_vm10, %v127_v35, %v125_v33  ;;  %v168_v10 = vand.u32 3, %v167_v3  ;;  %vm324_vm14 = vcmp.lt.s32.totalorder %v323_v9, 2  ;;  %vm325_vm15 = vcmp.eq.s32.totalorder %v323_v9, 0 }
  0xac   :  { %v129_v38 = vclz %v128_v36  ;;  %vm328_vm3 = vcmp.eq.s32.totalorder %v323_v9, 2 }
  0xad   :  { %vm169_vm0 = vcmp.lt.s32.totalorder %v168_v10, 2  ;;  %vm170_vm1 = vcmp.eq.s32.totalorder %v168_v10, 0  ;;  %vm173_vm2 = vcmp.eq.s32.totalorder %v168_v10, 2 }
  0xae   :  { %v351_v39 = vadd.s32 4294967294, %v129_v38 }
  0xb0   :  { %vm352_vm11 = vcmp.lt.s32.totalorder %v351_v39, 0 }
  0xb1   :  { %v132_v40 = vsel %vm352_vm11, 0, %v351_v39 }
  0xb2   :  { %v133_v41 = vsub.s32 32, %v132_v40  ;;  %v137_v42 = vsub.s32 4294967266, %v132_v40  ;;  %v134_v43 = vshll.u32 %v125_v33, %v132_v40 }
  0xb4   :  { %v135_v44 = vshrl.u32 %v117_v15, %v133_v41  ;;  %v138_v45 = vadd.s32 127, %v137_v42 }
  0xb6   :  { %v136_v37 = vor.u32 %v135_v44, %v134_v43  ;;  %v139_v46 = vshll.u32 %v138_v45, 23 }
  0xb8   :  { %v140_v47 = vor.u32 4788187, %v139_v46  ;;  %v143_v49 = vcvt.s32.f32 %v136_v37 }
  0xba   :  { %v141_v48 = vand.u32 2147483647, %v140_v47 }
  0xbc   :  { %v144_v50 = vmul.f32 %v143_v49, %v141_v48 }
  0xbe   :  { %v145_v51 = vxor.u32 2147483648, %v144_v50 }
  0xc0   :  { %v146_v52 = vsel %vm25_vm12, %v145_v51, %v144_v50 }
  0xc1   :  { %v149_v54 = vsel %vm24_vm13, %v422_v4, %v146_v52 }
  0xc2   :  { %v151_v55 = vmul.f32 %v149_v54, %v149_v54 }
  0xc4   :  { %v152_v56 = vmul.f32 -0.001358992, %v151_v55  ;;  %v159_v57 = vmul.f32 -0.00019511016, %v151_v55 }
  0xc6   :  { %v153_v59 = vadd.f32 0.041655596, %v152_v56  ;;  %v160_v60 = vadd.f32 0.008332121, %v159_v57 }
  0xc8   :  { %v154_v62 = vmul.f32 %v153_v59, %v151_v55  ;;  %v161_v63 = vmul.f32 %v160_v60, %v151_v55 }
  0xca   :  { %v155_v0 = vadd.f32 -0.4999988, %v154_v62  ;;  %v162_v2 = vadd.f32 -0.16666654, %v161_v63 }
  0xcc   :  { %v156_v5 = vmul.f32 %v155_v0, %v151_v55  ;;  %v163_v6 = vmul.f32 %v162_v2, %v151_v55 }
  0xce   :  { %v157_v7 = vadd.f32 1.0, %v156_v5  ;;  %v164_v8 = vadd.f32 1.0, %v163_v6 }
  0xd0   :  { %v165_v11 = vmul.f32 %v164_v8, %v149_v54  ;;  %v174_v12 = vxor.u32 2147483648, %v157_v7 }
  0xd2   :  { %v171_v14 = vxor.u32 2147483648, %v165_v11  ;;  %v175_v18 = vsel %vm173_vm2, %v174_v12, %v165_v11  ;;  %v330_v20 = vsel %vm328_vm3, %v174_v12, %v165_v11 }
  0xd4   :  { %v172_v17 = vsel %vm170_vm1, %v157_v7, %v171_v14  ;;  %v327_v19 = vsel %vm325_vm15, %v157_v7, %v171_v14 }
  0xd5   :  { %v176_v21 = vsel %vm169_vm0, %v172_v17, %v175_v18  ;;  %v331_v22 = vsel %vm324_vm14, %v327_v19, %v330_v20 }
  0xd6   :  { %v177_v23 = vsel %vm166_vm4, nan, %v176_v21  ;;  %v332_v24 = vsel %vm166_vm4, nan, %v331_v22 }
  0xd7   :  { %178 = vst [vmem:[#allocation2] sm:$0xff] %v177_v23 }
  0xd8   :  { %333 = vst [vmem:[#allocation2 + $0x8] sm:$0xff] %v332_v24 }
  0xd9   :  { %344 = dma.vmem_to_hbm [thread:$0]  %s340_s1, 256, %s342_s15, [#allocation3]  }
  0xda   :  { %390 = dma.done.wait [#allocation3], 256  }
  0xdb   :  { %391 = vsyncadd [#allocation3], 4294967040 }
  0xdc   :  { %349 = vsyncpa [#allocation3], 1 }

</bundles_post_ra>
